<compile_context>
chip_gen: v7x
topology: tpu7x:2x2x1
jax: 0.10.0
libtpu: 0.0.40
codegen_flags: <defaults>
</compile_context>

<pallas_src>
import functools

import jax
import jax.numpy as jnp
from jax.experimental import pallas as pl
from jax.experimental.pallas import tpu as pltpu

# Module hyper-parameters (deterministic, set in-script).
SCALE = 2.0
SHIFT = 0.5
LEN_SCALE = 1.5
OFFSET = 0.25

TARGET_BLOCK_BYTES = 4 << 20   # ~4 MiB blocks, dtype-invariant
VMEM_LIMIT_BYTES = 32 << 20    # 2*(in+out) 4 MiB blocks = 16 MiB + headroom;
                               # above v5e's 16 MiB scoped default, well under
                               # v7x's 64 MiB physical VMEM.
LANE_CHOICES = (1024, 512, 256, 128)


def _round_up(a, b):
    return pl.cdiv(a, b) * b


def _sigmoid_scale_shift_kernel(x_ref, o_ref, *, bias, amp, offset, half_inv_ls):
    # shift + scale*sigmoid((offset - x)/ls)
    #   = (shift + scale/2) + (scale/2)*tanh((offset - x)/(2*ls))
    # -> sub, mul (VPU), tanh (EUP), fma (VPU) per element.
    x = x_ref[...].astype(jnp.float32)
    z = (offset - x) * half_inv_ls
    o_ref[...] = (bias + amp * jnp.tanh(z)).astype(o_ref.dtype)


def sigmoid_scale_shift(x, scale=SCALE, shift=SHIFT, len_scale=LEN_SCALE, offset=OFFSET):
    """Elementwise shifted/scaled sigmoid; works for any input shape/dtype."""
    orig_shape = x.shape
    orig_dtype = x.dtype
    n = x.size

    if n == 0:  # zero-size guard (avoids a zero-row pallas_call / div-by-zero)
        return x

    itemsize = jnp.dtype(orig_dtype).itemsize
    sub = max(8, 32 // itemsize)  # min sublane multiple for this dtype

    # Lane width: largest of {1024,512,256,128} that divides n -> no padding.
    lanes = None
    for cand in LANE_CHOICES:
        if n % cand == 0:
            lanes = cand
            break
    needs_pad = lanes is None
    if needs_pad:
        lanes = 128  # minimal padding, still lane-dense / unmasked stores

    flat = x.reshape(-1)
    if needs_pad:
        n_padded = _round_up(n, lanes)
        flat = jnp.pad(flat, (0, n_padded - n))
    else:
        n_padded = n
    rows = n_padded // lanes
    slab = flat.reshape(rows, lanes)

    # Block rows: constant-byte budget; split into >=2 grid steps when rows
    # allow so "parallel" can shard across both v7x TensorCores.
    max_block_rows = max(sub, (TARGET_BLOCK_BYTES // (lanes * itemsize)) // sub * sub)
    if rows < sub:
        block_rows = rows  # block second-minor equals full array dim (allowed)
    else:
        block_rows = min(max_block_rows, _round_up(pl.cdiv(rows, 2), sub))
    grid = (pl.cdiv(rows, block_rows),)  # Pallas masks the ragged final block

    block_bytes = block_rows * lanes * itemsize

    kernel = functools.partial(
        _sigmoid_scale_shift_kernel,
        bias=float(shift) + 0.5 * float(scale),
        amp=0.5 * float(scale),
        offset=float(offset),
        half_inv_ls=0.5 / float(len_scale),
    )

    out_slab = pl.pallas_call(
        kernel,
        out_shape=jax.ShapeDtypeStruct((rows, lanes), orig_dtype),
        grid_spec=pltpu.PrefetchScalarGridSpec(
            num_scalar_prefetch=0,
            grid=grid,
            in_specs=[pl.BlockSpec((block_rows, lanes), lambda i: (i, 0))],
            out_specs=pl.BlockSpec((block_rows, lanes), lambda i: (i, 0)),
        ),
        compiler_params=pltpu.CompilerParams(
            dimension_semantics=("parallel",),
            vmem_limit_bytes=max(VMEM_LIMIT_BYTES, 4 * block_bytes + (8 << 20)),
        ),
        cost_estimate=pl.CostEstimate(
            flops=4 * n, transcendentals=n, bytes_accessed=2 * n * itemsize
        ),
    )(slab)

    if not needs_pad:
        return out_slab.reshape(orig_shape)
    return out_slab.reshape(-1)[:n].reshape(orig_shape)


def _reference(x, scale=SCALE, shift=SHIFT, len_scale=LEN_SCALE, offset=OFFSET):
    factor = -(x.astype(jnp.float32) - offset) / len_scale
    return (shift + jax.nn.sigmoid(factor) * scale).astype(x.dtype)


if __name__ == "__main__":
    key = jax.random.PRNGKey(0)

    # Main case: NCHW input, 2048 elements -> zero-copy lane-dense path.
    x = jax.random.normal(key, (2, 4, 16, 16), dtype=jnp.float32)
    out = jax.block_until_ready(sigmoid_scale_shift(x))
    ref = _reference(x)
    assert out.shape == x.shape and out.dtype == x.dtype
    assert jnp.allclose(out, ref, atol=2e-5, rtol=1e-5), "mismatch vs reference"

    # Unaligned case (105 elements) exercises the pad + ragged fallback path.
    x2 = jax.random.normal(jax.random.PRNGKey(0), (3, 5, 7), dtype=jnp.float32)
    out2 = jax.block_until_ready(sigmoid_scale_shift(x2))
    assert jnp.allclose(out2, _reference(x2), atol=2e-5, rtol=1e-5), "mismatch (unaligned)"

    print("KERNEL_OK")
</pallas_src>

<mosaic_0001>
module attributes {stable_mosaic.version = 11 : i64} {
  func.func @_sigmoid_scale_shift_kernel(%arg0: i32, %arg1: memref<2x1024xf32, #tpu.memory_space<vmem>>, %arg2: memref<2x1024xf32, #tpu.memory_space<vmem>>) attributes {dimension_semantics = [#tpu.dimension_semantics<parallel>], iteration_bounds = array<i64: 1>, scalar_prefetch = 0 : i64, scratch_operands = 0 : i64, tpu.core_type = #tpu.core_type<tc>, window_params = [{transform_indices = @transform_0, window_bounds = array<i64: 2, 1024>}, {transform_indices = @transform_1, window_bounds = array<i64: 2, 1024>}]} {
    %c0 = arith.constant 0 : index
    %c0_0 = arith.constant 0 : index
    %0 = vector.load %arg1[%c0, %c0_0] : memref<2x1024xf32, #tpu.memory_space<vmem>>, vector<2x1024xf32>
    %cst = arith.constant 2.500000e-01 : f32
    %1 = vector.broadcast %cst : f32 to vector<2x1024xf32>
    %2 = arith.subf %1, %0 : vector<2x1024xf32>
    %cst_1 = arith.constant 0.333333343 : f32
    %3 = vector.broadcast %cst_1 : f32 to vector<2x1024xf32>
    %4 = arith.mulf %2, %3 : vector<2x1024xf32>
    %5 = math.tanh %4 : vector<2x1024xf32>
    %cst_2 = arith.constant 1.000000e+00 : f32
    %6 = vector.broadcast %cst_2 : f32 to vector<2x1024xf32>
    %7 = arith.mulf %6, %5 : vector<2x1024xf32>
    %cst_3 = arith.constant 1.500000e+00 : f32
    %8 = vector.broadcast %cst_3 : f32 to vector<2x1024xf32>
    %9 = arith.addf %8, %7 : vector<2x1024xf32>
    %c0_4 = arith.constant 0 : index
    %c0_5 = arith.constant 0 : index
    %10 = vector.load %arg2[%c0_4, %c0_5] : memref<2x1024xf32, #tpu.memory_space<vmem>>, vector<2x1024xf32>
    tpu.vector_store %arg2[%c0_4, %c0_5], %9 {strides = array<i32>} : memref<2x1024xf32, #tpu.memory_space<vmem>>, vector<2x1024xf32>,
    return
  }
  func.func @transform_0(%arg0: i32) -> (i32, i32) {
    %c0_i32 = arith.constant 0 : i32
    %c0_i32_0 = arith.constant 0 : i32
    return %arg0, %c0_i32 : i32, i32
  }
  func.func @transform_1(%arg0: i32) -> (i32, i32) {
    %c0_i32 = arith.constant 0 : i32
    %c0_i32_0 = arith.constant 0 : i32
    return %arg0, %c0_i32 : i32, i32
  }
}

</mosaic_0001>

<bundles_post_ra>
// kernel: tpu_custom_call.1
= control target key start
LH: loop header
LB: loop body
LE: loop exit
PB: predicated region body
PF: predicated region fallthrough
CT: control target
= control target key end

     0   :  { %6 = vsyncpa [#allocation3], 0  ;;  %s138_s0 = inlined_call_operand.hbm [shape: f32[2,1024], index: 0, kind: input, shape index: {}]   ;;  %s139_s1 = inlined_call_operand.hbm [shape: f32[2,1024], index: 1, kind: output, shape index: {}]  }
   0x1   :  { %7 = vsyncpa [#allocation4], 0  ;;  %s102_s6 = smov [#allocation2]   ;;  %s54_s10 = scalar_lea.hbm %s138_s0, 256 }
   0x2   :  { %s14_s7 = sshll.u32 %s102_s6, 4  ;;  %p55_p0 = scmp.ne.s32.totalorder %s138_s0, %s54_s10  ;;  %s15_s7 = int_to_ptr.vmem [resolvable:$true] %s14_s7 }
   0x3   :  { %p58_p1 = scmp.lt.u32.totalorder %s54_s10, %s138_s0 }
   0x5   :  { %p60_p2 = pnand %p58_p1, %p55_p0 }
   0x7   :  { %63 = shalt.err (!%p60_p2)
}
   0x8   :  { %s64_s15 = scalar_lea.vmem %s15_s7, 256  ;;  %p69_p4 = scmp.lt.s32.totalorder %s15_s7, %s15_s7 }
   0x9   :  { %p65_p3 = scmp.ne.s32.totalorder %s15_s7, %s64_s15  ;;  %p70_p5 = scmp.lt.s32.totalorder %s64_s15, %s64_s15 }
   0xb   :  { %p71_p6 = por %p70_p5, %p69_p4 }
   0xd   :  { %p72_p7 = pnand %p71_p6, %p65_p3 }
   0xf   :  { %75 = shalt.err (!%p72_p7)
}
  0x10   :  { %17 = dma.hbm_to_vmem [thread:$0]  %s138_s0, 256, %s15_s7, [#allocation3]  }
  0x11   :  { %98 = dma.done.wait [#allocation3], 256  }
  0x12   :  { %99 = vsyncadd [#allocation3], 4294967040  ;;  %v21_v0 = vld [vmem:[#allocation2] sm:$0xff]  ;;  %v22_v1 = vld [vmem:[#allocation2 + $0x8] sm:$0xff]  ;;  %s103_s18 = smov [#allocation5]  }
  0x13   :  { %v23_v2 = vsub.f32 0.25, %v21_v0  ;;  %v24_v3 = vsub.f32 0.25, %v22_v1  ;;  %s39_s19 = sshll.u32 %s103_s18, 4  ;;  %s40_s19 = int_to_ptr.vmem [resolvable:$true] %s39_s19 }
  0x14   :  { %s76_s0 = scalar_lea.vmem %s40_s19, 256  ;;  %p81_p9 = scmp.lt.s32.totalorder %s40_s19, %s40_s19 }
  0x15   :  { %v25_v4 = vmul.f32 0.33333334, %v23_v2  ;;  %v26_v5 = vmul.f32 0.33333334, %v24_v3  ;;  %p77_p8 = scmp.ne.s32.totalorder %s40_s19, %s76_s0  ;;  %p82_p10 = scmp.lt.s32.totalorder %s76_s0, %s76_s0 }
  0x17   :  { %50 = vtanh.f32 %v25_v4  ;;  %p83_p11 = por %p82_p10, %p81_p9 }
  0x18   :  { %52 = vtanh.f32 %v26_v5 }
  0x19   :  { %p84_p12 = pnand %p83_p11, %p77_p8 }
  0x21   :  { %v51_v6 = vpop.eup %50 }
  0x22   :  { %v53_v7 = vpop.eup %52  ;;  %v29_v8 = vadd.f32 1.5, %v51_v6 }
  0x23   :  { %v30_v9 = vadd.f32 1.5, %v53_v7 }
  0x24   :  { %31 = vst [vmem:[#allocation5] sm:$0xff] %v29_v8 }
  0x25   :  { %32 = vst [vmem:[#allocation5 + $0x8] sm:$0xff] %v30_v9 }
  0x26   :  { %87 = shalt.err (!%p84_p12)
}
  0x27   :  { %s88_s22 = scalar_lea.hbm %s139_s1, 256 }
  0x28   :  { %p89_p13 = scmp.ne.s32.totalorder %s139_s1, %s88_s22  ;;  %p92_p0 = scmp.lt.u32.totalorder %s88_s22, %s139_s1 }
  0x2a   :  { %p94_p1 = pnand %p92_p0, %p89_p13 }
  0x2c   :  { %97 = shalt.err (!%p94_p1)
}
  0x2d   :  { %42 = dma.vmem_to_hbm [thread:$0]  %s40_s19, 256, %s139_s1, [#allocation4]  }
  0x2e   :  { %100 = dma.done.wait [#allocation4], 256  }
  0x2f   :  { %101 = vsyncadd [#allocation4], 4294967040 }
  0x30   :  { %46 = vsyncpa [#allocation3], 1 }
  0x31   :  { %47 = vsyncpa [#allocation4], 1 }

</bundles_post_ra>
